<compile_context>
chip_gen: v7x
topology: tpu7x:2x2x1
jax: 0.10.0
libtpu: 0.0.40
codegen_flags: <defaults>
</compile_context>

<pallas_src>
import jax
import jax.numpy as jnp
from jax.experimental import pallas as pl
from jax.experimental.pallas import tpu as pltpu


EPS = 1e-6


# ---------------------------------------------------------------------------
# Kernel
# ---------------------------------------------------------------------------
def rmsnorm_kernel(x_ref, w_ref, o_ref):
    # x_ref: (TM, D) tile of the flattened input, w_ref: (1, D) weight row.
    x = x_ref[...].astype(jnp.float32)
    var = jnp.mean(x * x, axis=-1, keepdims=True)
    xn = x * jax.lax.rsqrt(var + EPS)                    # EUP rsqrt
    o_ref[...] = (xn * w_ref[...].astype(jnp.float32)).astype(o_ref.dtype)


# ---------------------------------------------------------------------------
# Wrapper
# ---------------------------------------------------------------------------
def _round_up(a, b):
    return ((a + b - 1) // b) * b


def rmsnorm(x, weight, *, tile_bytes=2 << 20, max_rows=4096):
    """RMSNorm over the last axis of `x` with learnable `weight` (shape (D,))."""
    orig_shape = x.shape
    D = orig_shape[-1]
    x2 = x.reshape(-1, D)
    R = x2.shape[0]

    # --- VMEM-budgeted row tile ---------------------------------------------
    # Target ~tile_bytes per (tm, D) tile in the input dtype; multiple of 8
    # (sublane granularity).  bf16 inputs therefore get 2x the rows of f32.
    bytes_per_row = max(1, D * jnp.dtype(x2.dtype).itemsize)
    tm = max(8, (int(tile_bytes // bytes_per_row) // 8) * 8)
    tm = min(tm, max_rows)
    if R >= 16:
        # Keep >= 2 grid steps so v7x's two TensorCores both get work.
        tm = min(tm, max(8, _round_up((R + 1) // 2, 8)))
    if R <= 8:
        tm = R                     # full-extent block (exempt from 8-row rule)
    else:
        tm = min(tm, (R // 8) * 8)  # never larger than the row count

    grid = (pl.cdiv(R, tm),)       # ragged last block handled by Pallas
    w2 = weight.reshape(1, D)

    out = pl.pallas_call(
        rmsnorm_kernel,
        out_shape=jax.ShapeDtypeStruct((R, D), x.dtype),
        grid_spec=pltpu.PrefetchScalarGridSpec(
            num_scalar_prefetch=0,
            grid=grid,
            in_specs=[
                pl.BlockSpec((tm, D), lambda i: (i, 0)),   # activation tile
                # Constant block index -> fetched once, stays resident in VMEM.
                pl.BlockSpec((1, D), lambda i: (0, 0)),
            ],
            out_specs=pl.BlockSpec((tm, D), lambda i: (i, 0)),
        ),
        compiler_params=pltpu.CompilerParams(
            dimension_semantics=("parallel",),
            vmem_limit_bytes=32 << 20,     # raise v5e's 16 MiB scoped default
        ),
    )(x2, w2)

    return out.reshape(orig_shape)


# ---------------------------------------------------------------------------
# Pure-JAX reference (mirrors the PyTorch forward)
# ---------------------------------------------------------------------------
def ref_rmsnorm(x, weight):
    xf = x.astype(jnp.float32)
    var = jnp.mean(xf * xf, axis=-1, keepdims=True)
    xn = xf * jax.lax.rsqrt(var + EPS)
    return (weight.astype(jnp.float32) * xn).astype(x.dtype)


# ---------------------------------------------------------------------------
# main
# ---------------------------------------------------------------------------
if __name__ == "__main__":
    key = jax.random.PRNGKey(0)
    k_x, k_w = jax.random.split(key, 2)

    B, S, D = 2, 128, 512          # 256 rows -> 2 grid steps of 128 rows
    x_f32 = jax.random.normal(k_x, (B, S, D), dtype=jnp.float32)
    weight = jnp.ones((D,), jnp.float32) + 0.1 * jax.random.normal(k_w, (D,), jnp.float32)

    # f32 input path
    out = jax.block_until_ready(rmsnorm(x_f32, weight))
    ref = jax.block_until_ready(ref_rmsnorm(x_f32, weight))
    assert out.shape == (B, S, D) and out.dtype == x_f32.dtype
    assert jnp.allclose(out, ref, atol=1e-5, rtol=1e-5), (
        f"f32 max abs diff {float(jnp.max(jnp.abs(out - ref)))}")

    # bf16 input path (exercises the cast-to-f32 / cast-back semantics and the
    # byte-budgeted tile doubling)
    x_bf16 = x_f32.astype(jnp.bfloat16)
    out_bf = jax.block_until_ready(rmsnorm(x_bf16, weight))
    ref_bf = ref_rmsnorm(x_bf16, weight)
    assert out_bf.dtype == jnp.bfloat16
    diff = jnp.max(jnp.abs(out_bf.astype(jnp.float32) - ref_bf.astype(jnp.float32)))
    assert float(diff) <= 2e-2, f"bf16 max abs diff {float(diff)}"

    # Non-divisible row count (ragged last block, no wrapper pad/slice)
    x_odd = jax.random.normal(k_x, (3, 37, D), dtype=jnp.float32)
    out_odd = jax.block_until_ready(rmsnorm(x_odd, weight))
    ref_odd = ref_rmsnorm(x_odd, weight)
    assert jnp.allclose(out_odd, ref_odd, atol=1e-5, rtol=1e-5)

    # Larger row count: exercises the full 2 MiB (1024-row) tile budget
    x_big = jax.random.normal(k_x, (4, 512, D), dtype=jnp.float32)
    out_big = jax.block_until_ready(rmsnorm(x_big, weight))
    ref_big = ref_rmsnorm(x_big, weight)
    assert jnp.allclose(out_big, ref_big, atol=1e-5, rtol=1e-5)

    print("KERNEL_OK")
</pallas_src>

<mosaic_0001>
module attributes {stable_mosaic.version = 11 : i64} {
  func.func @rmsnorm_kernel(%arg0: i32, %arg1: memref<128x512xf32, #tpu.memory_space<vmem>>, %arg2: memref<1x512xf32, #tpu.memory_space<vmem>>, %arg3: memref<128x512xf32, #tpu.memory_space<vmem>>) attributes {dimension_semantics = [#tpu.dimension_semantics<parallel>], iteration_bounds = array<i64: 2>, scalar_prefetch = 0 : i64, scratch_operands = 0 : i64, tpu.core_type = #tpu.core_type<tc>, window_params = [{transform_indices = @transform_0, window_bounds = array<i64: 128, 512>}, {pipeline_mode = #tpu.pipeline_mode<synchronous>, transform_indices = @transform_1, window_bounds = array<i64: 1, 512>}, {transform_indices = @transform_2, window_bounds = array<i64: 128, 512>}]} {
    %c0 = arith.constant 0 : index
    %c0_0 = arith.constant 0 : index
    %0 = vector.load %arg1[%c0, %c0_0] : memref<128x512xf32, #tpu.memory_space<vmem>>, vector<128x512xf32>
    %1 = arith.mulf %0, %0 : vector<128x512xf32>
    %cst = arith.constant dense<0.000000e+00> : vector<128xf32>
    %2 = vector.multi_reduction <add>, %1, %cst [1] : vector<128x512xf32> to vector<128xf32>
    %3 = vector.shape_cast %2 : vector<128xf32> to vector<128x1xf32>
    %cst_1 = arith.constant 5.120000e+02 : f32
    %4 = vector.broadcast %cst_1 : f32 to vector<128x1xf32>
    %5 = arith.divf %3, %4 : vector<128x1xf32>
    %cst_2 = arith.constant 9.99999997E-7 : f32
    %6 = vector.broadcast %cst_2 : f32 to vector<128x1xf32>
    %7 = arith.addf %5, %6 : vector<128x1xf32>
    %8 = math.rsqrt %7 : vector<128x1xf32>
    %9 = vector.broadcast %8 : vector<128x1xf32> to vector<128x512xf32>
    %10 = arith.mulf %0, %9 : vector<128x512xf32>
    %c0_3 = arith.constant 0 : index
    %c0_4 = arith.constant 0 : index
    %11 = vector.load %arg2[%c0_3, %c0_4] : memref<1x512xf32, #tpu.memory_space<vmem>>, vector<1x512xf32>
    %12 = vector.broadcast %11 : vector<1x512xf32> to vector<128x512xf32>
    %13 = arith.mulf %10, %12 : vector<128x512xf32>
    %c0_5 = arith.constant 0 : index
    %c0_6 = arith.constant 0 : index
    %14 = vector.load %arg3[%c0_5, %c0_6] : memref<128x512xf32, #tpu.memory_space<vmem>>, vector<128x512xf32>
    tpu.vector_store %arg3[%c0_5, %c0_6], %13 {strides = array<i32>} : memref<128x512xf32, #tpu.memory_space<vmem>>, vector<128x512xf32>,
    return
  }
  func.func @transform_0(%arg0: i32) -> (i32, i32) {
    %c0_i32 = arith.constant 0 : i32
    %c0_i32_0 = arith.constant 0 : i32
    return %arg0, %c0_i32 : i32, i32
  }
  func.func @transform_1(%arg0: i32) -> (i32, i32) {
    %c0_i32 = arith.constant 0 : i32
    %c0_i32_0 = arith.constant 0 : i32
    %c0_i32_1 = arith.constant 0 : i32
    return %c0_i32, %c0_i32_0 : i32, i32
  }
  func.func @transform_2(%arg0: i32) -> (i32, i32) {
    %c0_i32 = arith.constant 0 : i32
    %c0_i32_0 = arith.constant 0 : i32
    return %arg0, %c0_i32 : i32, i32
  }
}

</mosaic_0001>

<bundles_post_ra>
// kernel: tpu_custom_call.1
= control target key start
LH: loop header
LB: loop body
LE: loop exit
PB: predicated region body
PF: predicated region fallthrough
CT: control target
= control target key end

     0   :  { %7 = vsyncpa [#allocation3], 0  ;;  %s1753_s0 = inlined_call_operand.hbm [shape: f32[256,512], index: 0, kind: input, shape index: {}]   ;;  %s1754_s1 = inlined_call_operand.hbm [shape: f32[1,512], index: 1, kind: input, shape index: {}]   ;;  %s1755_s2 = inlined_call_operand.hbm [shape: f32[256,512], index: 2, kind: output, shape index: {}]  }
   0x1   :  { %9 = vsyncpa [#allocation3 + $0x1], 0 }
   0x2   :  { %10 = vsyncpa [#allocation6], 0 }
   0x3   :  { %11 = vsyncpa [#allocation4], 0 }
   0x4   :  { %13 = vsyncpa [#allocation4 + $0x1], 0  ;;  %s1014_s9 = smov 0   ;;  %s1016_s10 = smov 0  }
   0x5   :  { %s1018_s11 = smov 0   ;;  %s1020_s12 = smov 0  }
   0x6 LB: > { %s1035_s13 = sadd.s32 4294967295, %s990_s12   ;;  %s747_s14 = sadd.s32 4294967294, %s990_s12   ;;  %s990_s12 = sphi %s1020_s12, %s1846_s12   ;;  %s986_s11 = sphi %s1018_s11, %s1845_s11   ;;  %s982_s10 = sphi %s1016_s10, %s1844_s10   ;;  %s978_s9 = sphi %s1014_s9, %s1843_s9  }
   0x7   : > { %s1039_s15 = sadd.s32 1, %s990_s12   ;;  %s26_s16 = sadd.s32 1, %s986_s11 }
   0x8   : > { %s23_s17 = ssub.s32 %s990_s12, %s1039_s15  ;;  %p33_p0 = scmp.ne.s32.totalorder %s986_s11, %s982_s10 }
   0x9   : > { %p24_p1 = scmp.eq.s32.totalorder %s23_s17, 0  ;;  %p34_p2 = scmp.eq.s32.totalorder %s990_s12, 0 }
   0xa   : > { %p39_p3 = scmp.ne.s32.totalorder %s982_s10, %s978_s9  ;;  %p1756_p4 = scmp.eq.s32.totalorder %s1035_s13, 0 }
   0xb   : > { %s1051_s18 = scalar_select %p24_p1, %s986_s11, %s26_s16  }
   0xc   : > { %p1053_p5 = por %p34_p2, %p33_p0  ;;  %p1059_p6 = por %p1756_p4, %p39_p3 }
   0xd   : > { %p84_p7 = scmp.eq.s32.totalorder %s1035_s13, 1  ;;  %p90_p8 = scmp.eq.s32.totalorder %s747_s14, 1 }
   0xe   : > { %s1784_s20 = scalar_select %p1059_p6, 1, 0 }
   0xf   : > { %p748_p9 = scmp.ge.s32.totalorder %s990_s12, 1  ;;  %p97_p10 = scmp.lt.s32.totalorder %s990_s12, 3 }
  0x10   : > { %p1066_p11 = por %p84_p7, %p33_p0  ;;  %p1070_p12 = por %p90_p8, %p39_p3 }
  0x11   : > { %p1074_p13 = pnand %p748_p9, %p97_p10  ;;  %s992_s24 = smov [#allocation5]  }
  0x12   : > { %s1785_s21 = scalar_select %p1066_p11, 1, 0 }
  0x13   : > { %s1786_s22 = scalar_select %p1070_p12, 1, 0 }
  0x14   : > { %s1787_s23 = scalar_select %p1074_p13, 1, 0 }
  0x15   : > { %p777_p2 = pneg %p1074_p13  ;;  %s110_s25 = sshll.u32 %s992_s24, 4  ;;  %s111_s25 = int_to_ptr.vmem [resolvable:$true] %s110_s25 }
  0x16   : > { %p790_p4 = scmp.lt.s32.totalorder %s990_s12, 2  ;;  %p1788_p0 = scmp.eq.s32.totalorder %s1035_s13, 0 }
  0x17   : > { %s121_s27 = sand.u32 1, %s986_s11   ;;  %s862_s4 = scalar_lea.hbm %s1754_s1, 64 }
  0x18   : > { %p1084_p7 = pnand %p777_p2, %p1788_p0  ;;  %p1091_p3 = pnand %p790_p4, %p1053_p5 }
  0x19   : > { %s751_s29 = sshll.u32 %s121_s27, 9  ;;  %p863_p8 = scmp.ne.s32.totalorder %s1754_s1, %s862_s4 }
  0x1a   : > { %s1790_s28 = scalar_select %p1091_p3, 1, 0 }
  0x1b   : > { %p864_p9 = pneg %p1084_p7  ;;  %p869_p4 = scmp.lt.u32.totalorder %s862_s4, %s1754_s1 }
  0x1d   : > { %p865_p10 = pnand %p864_p9, %p863_p8 }
  0x1f   : > { %p866_p2 = pneg %p865_p10 }
  0x21   : > { %p871_p5 = pnand %p869_p4, %p866_p2 }
  0x23   : > { %874 = shalt.err (!%p871_p5)
}
  0x24   : > { %s875_s14 = scalar_lea.vmem %s111_s25, 64  ;;  %p883_p11 = scmp.lt.s32.totalorder %s111_s25, %s111_s25 }
  0x25   : > { %p876_p0 = scmp.ne.s32.totalorder %s111_s25, %s875_s14  ;;  %p884_p6 = scmp.lt.s32.totalorder %s875_s14, %s875_s14 }
  0x27   : > { %p878_p1 = pnand %p876_p0, %p864_p9  ;;  %p885_p13 = por %p884_p6, %p883_p11 }
  0x29   : > { %p879_p12 = pneg %p878_p1 }
  0x2b   : > { %p886_p3 = pnand %p885_p13, %p879_p12 }
  0x2d   : > { %889 = shalt.err (!%p886_p3)
}
  0x2e   : > { %780 = dma.hbm_to_vmem [thread:$0]  (!%p1084_p7), %s1754_s1, 64, %s111_s25, [#allocation6]  }
  0x2f   : > { %s766_s19 = sshll.u32 %s990_s12, 13  ;;  %s125_s24 = scalar_lea.vmem [#allocation2], %s751_s29 }
  0x30   : > { %s133_s30 = sshll.u32 %s125_s24, 4  ;;  %s1115_s5 = scalar_lea.hbm %s1753_s0, %s766_s19  ;;  %s1117_s30 = int_to_ptr.vmem [resolvable:$true] %s133_s30 }
  0x31   : > { %s1119_s26 = scalar_lea.sflag [#allocation3], %s121_s27  ;;  %s890_s6 = scalar_lea.hbm %s1115_s5, 8192 }
  0x32   : > { %p891_p6 = scmp.ne.s32.totalorder %s1115_s5, %s890_s6  ;;  %p1791_p11 = scmp.ne.s32.totalorder %s1790_s28, 0 }
  0x33   : > { %s895_s7 = scalar_lea.hbm %s1753_s0, 16384  ;;  %p896_p7 = scmp.lt.u32.totalorder %s1115_s5, %s1753_s0 }
  0x34   : > { %p892_p12 = pneg %p1791_p11  ;;  %p897_p3 = scmp.lt.u32.totalorder %s895_s7, %s890_s6 }
  0x35   : > { %p899_p9 = scmp.lt.u32.totalorder %s890_s6, %s1115_s5 }
  0x36   : > { %p893_p13 = pnand %p892_p12, %p891_p6  ;;  %p898_p8 = por %p897_p3, %p896_p7 }
  0x38   : > { %p894_p1 = pneg %p893_p13  ;;  %p900_p10 = por %p899_p9, %p898_p8 }
  0x3a   : > { %p901_p2 = pnand %p900_p10, %p894_p1 }
  0x3c   : > { %904 = shalt.err (!%p901_p2)
}
  0x3d   : > { %s905_s27 = scalar_lea.vmem %s1117_s30, 8192  ;;  %s993_s16 = smov [#allocation2]  }
  0x3e   : > { %p906_p4 = scmp.ne.s32.totalorder %s1117_s30, %s905_s27  ;;  %s910_s17 = sshll.u32 %s993_s16, 4  ;;  %s911_s17 = int_to_ptr.vmem [resolvable:$false] %s910_s17 }
  0x3f   : > { %s912_s19 = scalar_lea.vmem %s911_s17, 16384  ;;  %p913_p6 = scmp.lt.s32.totalorder %s1117_s30, %s911_s17 }
  0x40   : > { %p908_p5 = pnand %p906_p4, %p892_p12  ;;  %p914_p13 = scmp.lt.s32.totalorder %s912_s19, %s905_s27 }
  0x42   : > { %p909_p0 = pneg %p908_p5  ;;  %p915_p7 = por %p914_p13, %p913_p6 }
  0x44   : > { %p916_p3 = pnand %p915_p7, %p909_p0 }
  0x46   : > { %919 = shalt.err (!%p916_p3)
}
  0x47   : > { %s994_s24 = smov 512   ;;  %s995_s3 = smov 32  }
  0x48   : > { %784 = dma.hbm_to_vmem [thread:$0]  (!%p1791_p11), %s1115_s5, 8192, %s1117_s30, %s1119_s26, %s994_s24, %s994_s24, %s995_s3  }
  0x49   : > { %p1792_p12 = scmp.ne.s32.totalorder %s1787_s23, 0 }
  0x4b   : > { %145 = sbr.rel (%p1792_p12) target bundleno = 321 (0x141), region = 28 }
  0x52   : > { %s1150_s4 = sand.u32 1, %s982_s10   ;;  %p1793_p1 = scmp.ne.s32.totalorder %s1784_s20, 0 }
  0x53   : > { %s756_s6 = sshll.u32 %s1150_s4, 9  ;;  %s148_s25 = scalar_lea.sflag [#allocation3], %s1150_s4 }
  0x54   : > { %s1156_s29 = scalar_lea.vmem [#allocation2], %s756_s6 }
  0x55   : > { %965 = dma.done.wait (%p1793_p1), %s148_s25, 8192  }
  0x56   : > { %967 = vsyncadd (%p1793_p1), %s148_s25, 4294959104  ;;  %p1794_p11 = scmp.eq.s32.totalorder %s1035_s13, 0 }
  0x58   : > { %969 = dma.done.wait (%p1794_p11), [#allocation6], 64   ;;  %p1795_p8 = pmov %p1794_p11 }
  0x59   : > { %v1167_v0 = vld [vmem:[%s1156_s29 + $0x40] sm:$0xff]  ;;  %v1170_v1 = vld [vmem:[%s1156_s29 + $0x48] sm:$0xff]  ;;  %v1173_v2 = vld [vmem:[%s1156_s29 + $0x50] sm:$0xff]  ;;  %s1520_s20 = scalar_lea.vmem [#allocation7], %s756_s6  ;;  %s768_s23 = sshll.u32 %s1035_s13, 13 }
  0x5a   : > { %971 = vsyncadd (%p1795_p8), [#allocation6], 4294967232  ;;  %v1176_v3 = vld [vmem:[%s1156_s29 + $0x58] sm:$0xff]  ;;  %v250_v4 = vmul.f32 %v1167_v0, %v1167_v0  ;;  %v251_v5 = vmul.f32 %v1170_v1, %v1170_v1  ;;  %v252_v6 = vmul.f32 %v1173_v2, %v1173_v2  ;;  %v1185_v7 = vld [vmem:[%s1156_s29] sm:$0xff]  ;;  %s664_s28 = sshll.u32 %s1520_s20, 4  ;;  %s1699_s5 = scalar_lea.hbm %s1755_s2, %s768_s23  ;;  %s1701_s28 = int_to_ptr.vmem [resolvable:$true] %s664_s28 }
  0x5b   : > { %v1188_v8 = vld [vmem:[%s1156_s29 + $0x8] sm:$0xff]  ;;  %v253_v9 = vmul.f32 %v1176_v3, %v1176_v3  ;;  %v1193_v10 = vld [vmem:[%s1156_s29 + $0x10] sm:$0xff]  ;;  %v1196_v11 = vld [vmem:[%s1156_s29 + $0x18] sm:$0xff]  ;;  %v242_v12 = vmul.f32 %v1185_v7, %v1185_v7  ;;  %s650_s26 = scalar_lea.sflag [#allocation4], %s1150_s4  ;;  %s920_s7 = scalar_lea.vmem %s1701_s28, 8192 }
  0x5c   : > { %v243_v13 = vmul.f32 %v1188_v8, %v1188_v8  ;;  %v1203_v14 = vld [vmem:[%s1156_s29 + $0x60] sm:$0xff]  ;;  %v316_v15 = vadd.f32 %v251_v5, %v250_v4  ;;  %v244_v16 = vmul.f32 %v1193_v10, %v1193_v10  ;;  %v245_v17 = vmul.f32 %v1196_v11, %v1196_v11  ;;  %v1210_v18 = vld [vmem:[%s1156_s29 + $0x68] sm:$0xff]  ;;  %v1213_v19 = vld [vmem:[%s1156_s29 + $0x70] sm:$0xff]  ;;  %p921_p9 = scmp.ne.s32.totalorder %s1701_s28, %s920_s7  ;;  %p1840_p10 = scmp.ne.s32.totalorder %s1785_s21, 0 }
  0x5d   : > { %v1216_v20 = vld [vmem:[%s1156_s29 + $0x78] sm:$0xff]  ;;  %v254_v21 = vmul.f32 %v1203_v14, %v1203_v14  ;;  %v255_v23 = vmul.f32 %v1210_v18, %v1210_v18  ;;  %v256_v24 = vmul.f32 %v1213_v19, %v1213_v19  ;;  %v1227_v26 = vld [vmem:[%s1156_s29 + $0x20] sm:$0xff]  ;;  %v1230_v27 = vld [vmem:[%s1156_s29 + $0x28] sm:$0xff]  ;;  %s996_s8 = smov [#allocation7]  }
  0x5e   : > { %v306_v22 = vadd.f32 %v243_v13, %v242_v12  ;;  %v257_v25 = vmul.f32 %v1216_v20, %v1216_v20  ;;  %v1233_v28 = vld [vmem:[%s1156_s29 + $0x30] sm:$0xff]  ;;  %v317_v29 = vadd.f32 %v316_v15, %v252_v6  ;;  %v1236_v30 = vld [vmem:[%s1156_s29 + $0x38] sm:$0xff]  ;;  %v246_v31 = vmul.f32 %v1227_v26, %v1227_v26  ;;  %v1245_v34 = vld [vmem:[%s1156_s29 + $0xa0] sm:$0xff]  ;;  %p922_p2 = pnand %p921_p9, %p1840_p10  ;;  %s924_s14 = sshll.u32 %s996_s8, 4  ;;  %s925_s14 = int_to_ptr.vmem [resolvable:$false] %s924_s14 }
  0x5f   : > { %v247_v32 = vmul.f32 %v1230_v27, %v1230_v27  ;;  %v248_v33 = vmul.f32 %v1233_v28, %v1233_v28  ;;  %v1248_v35 = vld [vmem:[%s1156_s29 + $0xa8] sm:$0xff]  ;;  %v321_v37 = vadd.f32 %v255_v23, %v254_v21  ;;  %v249_v38 = vmul.f32 %v1236_v30, %v1236_v30  ;;  %v1253_v39 = vld [vmem:[%s1156_s29 + $0xb0] sm:$0xff]  ;;  %v1256_v40 = vld [vmem:[%s1156_s29 + $0xb8] sm:$0xff]  ;;  %s926_s27 = scalar_lea.vmem %s925_s14, 16384  ;;  %p927_p5 = scmp.lt.s32.totalorder %s1701_s28, %s925_s14 }
  0x60   : > { %v307_v36 = vadd.f32 %v306_v22, %v244_v16  ;;  %v262_v41 = vmul.f32 %v1245_v34, %v1245_v34  ;;  %v1261_v42 = vld [vmem:[%s1156_s29 + $0x80] sm:$0xff]  ;;  %v318_v43 = vadd.f32 %v317_v29, %v253_v9  ;;  %v263_v45 = vmul.f32 %v1248_v35, %v1248_v35  ;;  %v1268_v47 = vld [vmem:[%s1156_s29 + $0x88] sm:$0xff]  ;;  %v1271_v48 = vld [vmem:[%s1156_s29 + $0x90] sm:$0xff]  ;;  %p923_p4 = pneg %p922_p2  ;;  %p928_p0 = scmp.lt.s32.totalorder %s926_s27, %s920_s7 }
  0x61   : > { %v311_v44 = vadd.f32 %v247_v32, %v246_v31  ;;  %v264_v46 = vmul.f32 %v1253_v39, %v1253_v39  ;;  %v1274_v49 = vld [vmem:[%s1156_s29 + $0x98] sm:$0xff]  ;;  %v322_v51 = vadd.f32 %v321_v37, %v256_v24  ;;  %v265_v52 = vmul.f32 %v1256_v40, %v1256_v40  ;;  %v1281_v54 = vld [vmem:[%s1156_s29 + $0xe0] sm:$0xff]  ;;  %v1284_v55 = vld [vmem:[%s1156_s29 + $0xe8] sm:$0xff] }
  0x62   : > { %v308_v50 = vadd.f32 %v307_v36, %v245_v17  ;;  %v258_v53 = vmul.f32 %v1261_v42, %v1261_v42  ;;  %v1287_v56 = vld [vmem:[%s1156_s29 + $0xf0] sm:$0xff]  ;;  %319 = vadd.xlane.f32.xlu1 %v318_v43  ;;  %v331_v58 = vadd.f32 %v263_v45, %v262_v41  ;;  %v259_v59 = vmul.f32 %v1268_v47, %v1268_v47  ;;  %v1294_v61 = vld [vmem:[%s1156_s29 + $0xf8] sm:$0xff]  ;;  %v1297_v62 = vld [vmem:[%s1156_s29 + $0xc0] sm:$0xff]  ;;  %p929_p6 = por %p928_p0, %p927_p5 }
  0x63   : > { %v312_v57 = vadd.f32 %v311_v44, %v248_v33  ;;  %v260_v60 = vmul.f32 %v1271_v48, %v1271_v48  ;;  %v1300_v63 = vld [vmem:[%s1156_s29 + $0xc8] sm:$0xff]  ;;  %v323_v4 = vadd.f32 %v322_v51, %v257_v25  ;;  %v261_v5 = vmul.f32 %v1274_v49, %v1274_v49  ;;  %v1309_v12 = vld [vmem:[%s1156_s29 + $0xd0] sm:$0xff]  ;;  %v1312_v13 = vld [vmem:[%s1156_s29 + $0xd8] sm:$0xff] }
  0x64   : > { %309 = vadd.xlane.f32.xlu0 %v308_v50  ;;  %v270_v6 = vmul.f32 %v1281_v54, %v1281_v54  ;;  %v271_v9 = vmul.f32 %v1284_v55, %v1284_v55  ;;  %v332_v16 = vadd.f32 %v331_v58, %v264_v46  ;;  %v326_v17 = vadd.f32 %v259_v59, %v258_v53  ;;  %v1317_v22 = vld [vmem:[%s1156_s29 + $0x120] sm:$0xff]  ;;  %v1320_v23 = vld [vmem:[%s1156_s29 + $0x128] sm:$0xff]  ;;  %v1329_v32 = vld [vmem:[%s1156_s29 + $0x130] sm:$0xff]  ;;  %p930_p13 = pnand %p929_p6, %p923_p4 }
  0x65   : > { %v313_v15 = vadd.f32 %v312_v57, %v249_v38  ;;  %v272_v21 = vmul.f32 %v1287_v56, %v1287_v56  ;;  %v273_v24 = vmul.f32 %v1294_v61, %v1294_v61  ;;  %v266_v29 = vmul.f32 %v1297_v62, %v1297_v62  ;;  %v1332_v33 = vld [vmem:[%s1156_s29 + $0x138] sm:$0xff]  ;;  %v1335_v36 = vld [vmem:[%s1156_s29 + $0x100] sm:$0xff]  ;;  %v1342_v44 = vld [vmem:[%s1156_s29 + $0x108] sm:$0xff] }
  0x66   : > { %v341_v25 = vadd.f32 %v271_v9, %v270_v6  ;;  %v267_v31 = vmul.f32 %v1300_v63, %v1300_v63  ;;  %324 = vadd.xlane.f32.xlu1 %v323_v4  ;;  %v333_v37 = vadd.f32 %v332_v16, %v265_v52  ;;  %v327_v38 = vadd.f32 %v326_v17, %v260_v60  ;;  %v1345_v45 = vld [vmem:[%s1156_s29 + $0x110] sm:$0xff]  ;;  %v1352_v53 = vld [vmem:[%s1156_s29 + $0x118] sm:$0xff]  ;;  %v1355_v57 = vld [vmem:[%s1156_s29 + $0x160] sm:$0xff] }
  0x67   : > { %v268_v41 = vmul.f32 %v1309_v12, %v1309_v12  ;;  %v269_v43 = vmul.f32 %v1312_v13, %v1312_v13  ;;  %1796 = vst [vmem:[#allocation11_spill] sm:$0xff] %v1342_v44  ;;  %1797 = vst [vmem:[#allocation12_spill] sm:$0xff] %v1345_v45  ;;  %v278_v51 = vmul.f32 %v1317_v22, %v1317_v22  ;;  %v1358_v58 = vld [vmem:[%s1156_s29 + $0x168] sm:$0xff]  ;;  %v1367_v9 = vld [vmem:[%s1156_s29 + $0x170] sm:$0xff] }
  0x68   : > { %314 = vadd.xlane.f32.xlu0 %v313_v15  ;;  %v342_v46 = vadd.f32 %v341_v25, %v272_v21  ;;  %v336_v50 = vadd.f32 %v267_v31, %v266_v29  ;;  %v279_v52 = vmul.f32 %v1320_v23, %v1320_v23  ;;  %1798 = vst [vmem:[#allocation13_spill] sm:$0xff] %v1352_v53  ;;  %1799 = vst [vmem:[#allocation14_spill] sm:$0xff] %v1355_v57  ;;  %v1375_v25 = vld [vmem:[%s1156_s29 + $0x148] sm:$0xff] }
  0x69   : > { %1800 = vst [vmem:[#allocation15_spill] sm:$0xff] %v1358_v58  ;;  %v328_v59 = vadd.f32 %v327_v38, %v261_v5  ;;  %v280_v60 = vmul.f32 %v1329_v32, %v1329_v32  ;;  %v281_v4 = vmul.f32 %v1332_v33, %v1332_v33  ;;  %v274_v6 = vmul.f32 %v1335_v36, %v1335_v36  ;;  %v1372_v5 = vld [vmem:[%s1156_s29 + $0x140] sm:$0xff] }
  0x6a   : > { %1801 = vst [vmem:[#allocation16_spill] sm:$0xff] %v1367_v9  ;;  %v343_v15 = vadd.f32 %v342_v46, %v273_v24  ;;  %v337_v16 = vadd.f32 %v336_v50, %v268_v41  ;;  %v351_v17 = vadd.f32 %v279_v52, %v278_v51  ;;  %v275_v21 = vmul.f32 %v1342_v44, %v1342_v44  ;;  %v1382_v24 = vld [vmem:[%s1156_s29 + $0x178] sm:$0xff]  ;;  %v1389_v46 = vld [vmem:[%s1156_s29 + $0x150] sm:$0xff] }
  0x6b   : > { %1802 = vst [vmem:[#allocation17_spill] sm:$0xff] %v1372_v5  ;;  %1803 = vst [vmem:[#allocation18_spill] sm:$0xff] %v1375_v25  ;;  %334 = vadd.xlane.f32.xlu1 %v333_v37  ;;  %v276_v29 = vmul.f32 %v1345_v45, %v1345_v45  ;;  %v277_v31 = vmul.f32 %v1352_v53, %v1352_v53  ;;  %v286_v38 = vmul.f32 %v1355_v57, %v1355_v57  ;;  %v1394_v53 = vld [vmem:[%s1156_s29 + $0x1a0] sm:$0xff]  ;;  %v1397_v45 = vld [vmem:[%s1156_s29 + $0x1a8] sm:$0xff] }
  0x6c   : > { %1804 = vst [vmem:[#allocation19_spill] sm:$0xff] %v1382_v24  ;;  %v287_v41 = vmul.f32 %v1358_v58, %v1358_v58  ;;  %1805 = vst [vmem:[#allocation20_spill] sm:$0xff] %v1389_v46  ;;  %329 = vadd.xlane.f32.xlu0 %v328_v59  ;;  %v338_v37 = vadd.f32 %v337_v16, %v269_v43  ;;  %v352_v50 = vadd.f32 %v351_v17, %v280_v60  ;;  %v1400_v57 = vld [vmem:[%s1156_s29 + $0x158] sm:$0xff]  ;;  %v1407_v59 = vld [vmem:[%s1156_s29 + $0x1b0] sm:$0xff] }
  0x6d   : > { %v346_v51 = vadd.f32 %v275_v21, %v274_v6  ;;  %v288_v52 = vmul.f32 %v1367_v9, %v1367_v9  ;;  %1806 = vst [vmem:[#allocation21_spill] sm:$0xff] %v1394_v53  ;;  %1807 = vst [vmem:[#allocation22_spill] sm:$0xff] %v1397_v45  ;;  %v282_v58 = vmul.f32 %v1372_v5, %v1372_v5  ;;  %v1410_v60 = vld [vmem:[%s1156_s29 + $0x180] sm:$0xff] }
  0x6e   : > { %v361_v44 = vadd.f32 %v287_v41, %v286_v38  ;;  %1808 = vst [vmem:[#allocation23_spill] sm:$0xff] %v1400_v57  ;;  %v283_v43 = vmul.f32 %v1375_v25, %v1375_v25  ;;  %1809 = vst [vmem:[#allocation24_spill] sm:$0xff] %v1407_v59  ;;  %v353_v6 = vadd.f32 %v352_v50, %v281_v4  ;;  %v1417_v38 = vld [vmem:[%s1156_s29 + $0x1b8] sm:$0xff]  ;;  %v1420_v41 = vld [vmem:[%s1156_s29 + $0x188] sm:$0xff] }
  0x6f   : > { %1810 = vst [vmem:[#allocation25_spill] sm:$0xff] %v1410_v60  ;;  %v347_v16 = vadd.f32 %v346_v51, %v276_v29  ;;  %v289_v17 = vmul.f32 %v1382_v24, %v1382_v24  ;;  %v284_v21 = vmul.f32 %v1389_v46, %v1389_v46  ;;  %1811 = vst [vmem:[#allocation26_spill] sm:$0xff] %v1417_v38  ;;  %344 = vadd.xlane.f32.xlu1 %v343_v15  ;;  %v1427_v29 = vld [vmem:[%s1156_s29 + $0x190] sm:$0xff]  ;;  %v1430_v50 = vld [vmem:[%s1156_s29 + $0x1e0] sm:$0xff] }
  0x70   : > { %1812 = vst [vmem:[#allocation27_spill] sm:$0xff] %v1420_v41  ;;  %v362_v25 = vadd.f32 %v361_v44, %v288_v52  ;;  %v356_v5 = vadd.f32 %v283_v43, %v282_v58  ;;  %v294_v9 = vmul.f32 %v1394_v53, %v1394_v53  ;;  %v295_v4 = vmul.f32 %v1397_v45, %v1397_v45  ;;  %v1433_v51 = vld [vmem:[%s1156_s29 + $0x1e8] sm:$0xff]  ;;  %v1440_v15 = vld [vmem:[%s1156_s29 + $0x198] sm:$0xff]  ;;  %v1445_v43 = vld [vmem:[%s1156_s29 + $0x1f0] sm:$0xff] }
  0x71   : > { %1813 = vst [vmem:[#allocation28_spill] sm:$0xff] %v1427_v29  ;;  %1814 = vst [vmem:[#allocation29_spill] sm:$0xff] %v1430_v50  ;;  %339 = vadd.xlane.f32.xlu0 %v338_v37  ;;  %v348_v46 = vadd.f32 %v347_v16, %v277_v31  ;;  %v285_v44 = vmul.f32 %v1400_v57, %v1400_v57  ;;  %v296_v58 = vmul.f32 %v1407_v59, %v1407_v59  ;;  %v1452_v16 = vld [vmem:[%s1156_s29 + $0x1c0] sm:$0xff]  ;;  %v1455_v57 = vld [vmem:[%s1156_s29 + $0x1c8] sm:$0xff] }
  0x72   : > { %1815 = vst [vmem:[#allocation30_spill] sm:$0xff] %v1433_v51  ;;  %v290_v52 = vmul.f32 %v1410_v60, %v1410_v60  ;;  %v357_v45 = vadd.f32 %v356_v5, %v284_v21  ;;  %v297_v53 = vmul.f32 %v1417_v38, %v1417_v38  ;;  %v371_v37 = vadd.f32 %v295_v4, %v294_v9  ;;  %v1464_v9 = vld [vmem:[%s1156_s29 + $0x1d0] sm:$0xff] }
  0x73   : > { %v291_v31 = vmul.f32 %v1420_v41, %v1420_v41  ;;  %1816 = vst [vmem:[#allocation31_spill] sm:$0xff] %v1455_v57  ;;  %v363_v59 = vadd.f32 %v362_v25, %v289_v17  ;;  %v292_v24 = vmul.f32 %v1427_v29, %v1427_v29  ;;  %v302_v5 = vmul.f32 %v1430_v50, %v1430_v50  ;;  %v1471_v29 = vld [vmem:[%s1156_s29 + $0x1f8] sm:$0xff] }
  0x74   : > { %v303_v21 = vmul.f32 %v1433_v51, %v1433_v51  ;;  %1817 = vst [vmem:[#allocation32_spill] sm:$0xff] %v1464_v9  ;;  %354 = vadd.xlane.f32.xlu1 %v353_v6  ;;  %v372_v4 = vadd.f32 %v371_v37, %v296_v58  ;;  %v293_v41 = vmul.f32 %v1440_v15, %v1440_v15  ;;  %v1478_v58 = vld [vmem:[%s1156_s29 + $0x1d8] sm:$0xff] }
  0x75   : > { %v366_v60 = vadd.f32 %v291_v31, %v290_v52  ;;  %v304_v25 = vmul.f32 %v1445_v43, %v1445_v43  ;;  %349 = vadd.xlane.f32.xlu0 %v348_v46  ;;  %v358_v17 = vadd.f32 %v357_v45, %v285_v44  ;;  %v298_v50 = vmul.f32 %v1452_v16, %v1452_v16 }
  0x76   : > { %v381_v38 = vadd.f32 %v303_v21, %v302_v5  ;;  %v299_v51 = vmul.f32 %v1455_v57, %v1455_v57  ;;  %v300_v52 = vmul.f32 %v1464_v9, %v1464_v9  ;;  %v373_v31 = vadd.f32 %v372_v4, %v297_v53 }
  0x77   : > { %v367_v6 = vadd.f32 %v366_v60, %v292_v24  ;;  %v305_v45 = vmul.f32 %v1471_v29, %v1471_v29  ;;  %v301_v5 = vmul.f32 %v1478_v58, %v1478_v58 }
  0x78   : > { %v376_v37 = vadd.f32 %v299_v51, %v298_v50  ;;  %364 = vadd.xlane.f32.xlu1 %v363_v59  ;;  %v382_v46 = vadd.f32 %v381_v38, %v304_v25  ;;  %v501_v50 = vlaneseq }
  0x79   : > { %359 = vadd.xlane.f32.xlu0 %v358_v17  ;;  %v368_v44 = vadd.f32 %v367_v6, %v293_v41 }
  0x7a   : > { %v377_v21 = vadd.f32 %v376_v37, %v300_v52  ;;  %v383_v24 = vadd.f32 %v382_v46, %v305_v45  ;;  %v502_v25 = vshrl.u32 %v501_v50, 7 }
  0x7c   : > { %374 = vadd.xlane.f32.xlu1 %v373_v31  ;;  %v378_v60 = vadd.f32 %v377_v21, %v301_v5  ;;  %v503_v45 = vsub.s32 0, %v502_v25  ;;  %v507_v46 = vsub.s32 1, %v502_v25  ;;  %v511_v21 = vsub.s32 2, %v502_v25 }
  0x7d   : > { %369 = vadd.xlane.f32.xlu0 %v368_v44 }
  0x80   : > { %384 = vadd.xlane.f32.xlu1 %v383_v24  ;;  %v515_v24 = vsub.s32 3, %v502_v25 }
  0x81   : > { %379 = vadd.xlane.f32.xlu0 %v378_v60 }
  0xef   : > { %v320_v9 = vpop.xlane.xlu1 %319 }
  0xf0   : > { %v389_v59 = vmul.f32 0.001953125, %v320_v9  ;;  %v499_v9 = vld [vmem:[#allocation5] sm:$0xf] }
  0xf1   : > { %v310_v53 = vpop.xlane.xlu0 %309 }
  0xf2   : > { %v387_v51 = vmul.f32 0.001953125, %v310_v53  ;;  %v405_v4 = vadd.f32 1e-06, %v389_v59 }
  0xf3   : > { %v325_v38 = vpop.xlane.xlu1 %324 }
  0xf4   : > { %v403_v57 = vadd.f32 1e-06, %v387_v51  ;;  %830 = vrsqrt.f32 %v405_v4  ;;  %v390_v41 = vmul.f32 0.001953125, %v325_v38  ;;  %v1486_v51 = vrot.slane %v499_v9, %v503_v45 }
  0xf5   : > { %v315_v17 = vpop.xlane.xlu0 %314  ;;  %v1488_v38 = vrot.slane %v499_v9, %v507_v46 }
  0xf6   : > { %832 = vrsqrt.f32 %v403_v57  ;;  %v388_v6 = vmul.f32 0.001953125, %v315_v17  ;;  %v406_v52 = vadd.f32 1e-06, %v390_v41  ;;  %v1490_v41 = vrot.slane %v499_v9, %v511_v21 }
  0xf7   : > { %v1492_v17 = vrot.slane %v499_v9, %v515_v24 }
  0xf8   : > { %v404_v37 = vadd.f32 1e-06, %v388_v6  ;;  %v335_v31 = vpop.xlane.xlu1 %334  ;;  %834 = vrsqrt.f32 %v406_v52 }
  0xf9   : > { %v392_v44 = vmul.f32 0.001953125, %v335_v31  ;;  %v330_v5 = vpop.xlane.xlu0 %329 }
  0xfa   : > { %836 = vrsqrt.f32 %v404_v37  ;;  %v391_v60 = vmul.f32 0.001953125, %v330_v5 }
  0xfb   : > { %v408_v59 = vadd.f32 1e-06, %v392_v44 }
  0xfc   : > { %v407_v50 = vadd.f32 1e-06, %v391_v60  ;;  %v345_v53 = vpop.xlane.xlu1 %344 }
  0xfd   : > { %838 = vrsqrt.f32 %v408_v59  ;;  %v394_v57 = vmul.f32 0.001953125, %v345_v53 }
  0xfe   : > { %v340_v4 = vpop.xlane.xlu0 %339  ;;  %840 = vrsqrt.f32 %v407_v50  ;;  %v831_v6 = vpop.eup %830 }
  0xff   : > { %v1494_v52 = vadd.f32 1e-06, %v394_v57  ;;  %v1496_v25 = vmul.f32 0.001953125, %v340_v4  ;;  %v443_v31 = vmul.f32 %v831_v6, %v1167_v0  ;;  %v444_v45 = vmul.f32 %v831_v6, %v1170_v1 }
 0x100   : > { %v833_v37 = vpop.eup %832  ;;  %v445_v44 = vmul.f32 %v831_v6, %v1173_v2  ;;  %v446_v46 = vmul.f32 %v831_v6, %v1176_v3 }
 0x101   : > { %v1502_v5 = vpop.xlane.xlu1 %354  ;;  %v435_v9 = vmul.f32 %v833_v37, %v1185_v7  ;;  %v436_v21 = vmul.f32 %v833_v37, %v1188_v8  ;;  %v437_v24 = vmul.f32 %v833_v37, %v1193_v10  ;;  %v438_v60 = vmul.f32 %v833_v37, %v1196_v11 }
 0x102   : > { %v1508_v59 = vpop.xlane.xlu0 %349  ;;  %v529_v0 = vmul.f32 %v1486_v51, %v443_v31  ;;  %v530_v1 = vmul.f32 %v1488_v38, %v444_v45  ;;  %v531_v2 = vmul.f32 %v1490_v41, %v445_v44  ;;  %v532_v3 = vmul.f32 %v1492_v17, %v446_v46  ;;  %v835_v50 = vpop.eup %834 }
 0x103   : > { %v521_v53 = vmul.f32 %v1486_v51, %v435_v9  ;;  %v522_v7 = vmul.f32 %v1488_v38, %v436_v21  ;;  %v523_v8 = vmul.f32 %v1490_v41, %v437_v24  ;;  %v524_v10 = vmul.f32 %v1492_v17, %v438_v60 }
 0x104   : > { %v837_v11 = vpop.eup %836  ;;  %593 = vst [vmem:[%s1520_s20 + $0x40] sm:$0xff] %v529_v0  ;;  %594 = vst [vmem:[%s1520_s20 + $0x48] sm:$0xff] %v530_v1  ;;  %v447_v57 = vmul.f32 %v835_v50, %v1203_v14  ;;  %v448_v4 = vmul.f32 %v835_v50, %v1210_v18  ;;  %v449_v6 = vmul.f32 %v835_v50, %v1213_v19  ;;  %842 = vrsqrt.f32 %v1494_v52 }
 0x105   : > { %595 = vst [vmem:[%s1520_s20 + $0x50] sm:$0xff] %v531_v2  ;;  %596 = vst [vmem:[%s1520_s20 + $0x58] sm:$0xff] %v532_v3  ;;  %v450_v37 = vmul.f32 %v835_v50, %v1216_v20  ;;  %v365_v31 = vpop.xlane.xlu1 %364  ;;  %v439_v45 = vmul.f32 %v837_v11, %v1227_v26  ;;  %v440_v44 = vmul.f32 %v837_v11, %v1230_v27 }
 0x106   : > { %585 = vst [vmem:[%s1520_s20] sm:$0xff] %v521_v53  ;;  %586 = vst [vmem:[%s1520_s20 + $0x8] sm:$0xff] %v522_v7  ;;  %v441_v14 = vmul.f32 %v837_v11, %v1233_v28  ;;  %v442_v18 = vmul.f32 %v837_v11, %v1236_v30  ;;  %v360_v19 = vpop.xlane.xlu0 %359  ;;  %v533_v20 = vmul.f32 %v1486_v51, %v447_v57  ;;  %v409_v57 = vadd.f32 1e-06, %v1496_v25 }
 0x107   : > { %587 = vst [vmem:[%s1520_s20 + $0x10] sm:$0xff] %v523_v8  ;;  %588 = vst [vmem:[%s1520_s20 + $0x18] sm:$0xff] %v524_v10  ;;  %v534_v46 = vmul.f32 %v1488_v38, %v448_v4  ;;  %v535_v9 = vmul.f32 %v1490_v41, %v449_v6  ;;  %v536_v21 = vmul.f32 %v1492_v17, %v450_v37  ;;  %v839_v26 = vpop.eup %838  ;;  %v396_v4 = vmul.f32 0.001953125, %v1502_v5 }
 0x108   : > { %v525_v27 = vmul.f32 %v1486_v51, %v439_v45  ;;  %v526_v28 = vmul.f32 %v1488_v38, %v440_v44  ;;  %v527_v30 = vmul.f32 %v1490_v41, %v441_v14  ;;  %v528_v24 = vmul.f32 %v1492_v17, %v442_v18  ;;  %v841_v60 = vpop.eup %840  ;;  %597 = vst [vmem:[%s1520_s20 + $0x60] sm:$0xff] %v533_v20 }
 0x109   : > { %598 = vst [vmem:[%s1520_s20 + $0x68] sm:$0xff] %v534_v46  ;;  %599 = vst [vmem:[%s1520_s20 + $0x70] sm:$0xff] %v535_v9  ;;  %v455_v0 = vmul.f32 %v839_v26, %v1245_v34  ;;  %v456_v1 = vmul.f32 %v839_v26, %v1248_v35  ;;  %v457_v2 = vmul.f32 %v839_v26, %v1253_v39  ;;  %v375_v50 = vpop.xlane.xlu1 %374  ;;  %v395_v6 = vmul.f32 0.001953125, %v1508_v59 }
 0x10a   : > { %600 = vst [vmem:[%s1520_s20 + $0x78] sm:$0xff] %v536_v21  ;;  %v458_v3 = vmul.f32 %v839_v26, %v1256_v40  ;;  %589 = vst [vmem:[%s1520_s20 + $0x20] sm:$0xff] %v525_v27  ;;  %v451_v53 = vmul.f32 %v841_v60, %v1261_v42  ;;  %v452_v7 = vmul.f32 %v841_v60, %v1268_v47  ;;  %v370_v39 = vpop.xlane.xlu0 %369  ;;  %v398_v45 = vmul.f32 0.001953125, %v365_v31 }
 0x10b   : > { %590 = vst [vmem:[%s1520_s20 + $0x28] sm:$0xff] %v526_v28  ;;  %591 = vst [vmem:[%s1520_s20 + $0x30] sm:$0xff] %v527_v30  ;;  %v453_v34 = vmul.f32 %v841_v60, %v1271_v48  ;;  %v454_v35 = vmul.f32 %v841_v60, %v1274_v49  ;;  %v541_v40 = vmul.f32 %v1486_v51, %v455_v0  ;;  %v397_v44 = vmul.f32 0.001953125, %v360_v19 }
 0x10c   : > { %592 = vst [vmem:[%s1520_s20 + $0x38] sm:$0xff] %v528_v24  ;;  %v542_v8 = vmul.f32 %v1488_v38, %v456_v1  ;;  %v543_v10 = vmul.f32 %v1490_v41, %v457_v2  ;;  %v544_v11 = vmul.f32 %v1492_v17, %v458_v3  ;;  %v537_v42 = vmul.f32 %v1486_v51, %v451_v53 }
 0x10d   : > { %v538_v47 = vmul.f32 %v1488_v38, %v452_v7  ;;  %v539_v48 = vmul.f32 %v1490_v41, %v453_v34  ;;  %v540_v49 = vmul.f32 %v1492_v17, %v454_v35  ;;  %605 = vst [vmem:[%s1520_s20 + $0xa0] sm:$0xff] %v541_v40  ;;  %v385_v37 = vpop.xlane.xlu1 %384  ;;  %v400_v14 = vmul.f32 0.001953125, %v375_v50 }
 0x10e   : > { %606 = vst [vmem:[%s1520_s20 + $0xa8] sm:$0xff] %v542_v8  ;;  %607 = vst [vmem:[%s1520_s20 + $0xb0] sm:$0xff] %v543_v10  ;;  %v399_v18 = vmul.f32 0.001953125, %v370_v39  ;;  %v380_v20 = vpop.xlane.xlu0 %379  ;;  %844 = vrsqrt.f32 %v409_v57  ;;  %v412_v46 = vadd.f32 1e-06, %v396_v4  ;;  %v402_v52 = vmul.f32 0.001953125, %v385_v37  ;;  %v843_v19 = vpop.eup %842 }
 0x10f   : > { %608 = vst [vmem:[%s1520_s20 + $0xb8] sm:$0xff] %v544_v11  ;;  %601 = vst [vmem:[%s1520_s20 + $0x80] sm:$0xff] %v537_v42  ;;  %v411_v9 = vadd.f32 1e-06, %v395_v6  ;;  %v414_v21 = vadd.f32 1e-06, %v398_v45  ;;  %v463_v28 = vmul.f32 %v843_v19, %v1281_v54  ;;  %v464_v30 = vmul.f32 %v843_v19, %v1284_v55 }
 0x110   : > { %602 = vst [vmem:[%s1520_s20 + $0x88] sm:$0xff] %v538_v47  ;;  %603 = vst [vmem:[%s1520_s20 + $0x90] sm:$0xff] %v539_v48  ;;  %v413_v25 = vadd.f32 1e-06, %v397_v44  ;;  %846 = vrsqrt.f32 %v412_v46  ;;  %v416_v5 = vadd.f32 1e-06, %v400_v14  ;;  %v465_v24 = vmul.f32 %v843_v19, %v1287_v56 }
 0x111   : > { %604 = vst [vmem:[%s1520_s20 + $0x98] sm:$0xff] %v540_v49  ;;  %v401_v26 = vmul.f32 0.001953125, %v380_v20  ;;  %848 = vrsqrt.f32 %v411_v9  ;;  %v415_v59 = vadd.f32 1e-06, %v399_v18  ;;  %v418_v27 = vadd.f32 1e-06, %v402_v52 }
 0x112   : > { %850 = vrsqrt.f32 %v414_v21  ;;  %v466_v60 = vmul.f32 %v843_v19, %v1294_v61  ;;  %v549_v1 = vmul.f32 %v1486_v51, %v463_v28  ;;  %v550_v2 = vmul.f32 %v1488_v38, %v464_v30  ;;  %v1818_v47 = vld [vmem:[#allocation11_spill] sm:$0xff]  ;;  %v1819_v49 = vld [vmem:[#allocation12_spill] sm:$0xff]  ;;  %v1820_v4 = vld [vmem:[#allocation13_spill] sm:$0xff] }
 0x113   : > { %852 = vrsqrt.f32 %v413_v25  ;;  %v417_v31 = vadd.f32 1e-06, %v401_v26  ;;  %v551_v3 = vmul.f32 %v1490_v41, %v465_v24  ;;  %v1821_v45 = vld [vmem:[#allocation14_spill] sm:$0xff]  ;;  %v1822_v14 = vld [vmem:[#allocation15_spill] sm:$0xff]  ;;  %v1823_v20 = vld [vmem:[#allocation16_spill] sm:$0xff] }
 0x114   : > { %854 = vrsqrt.f32 %v416_v5  ;;  %v552_v54 = vmul.f32 %v1492_v17, %v466_v60  ;;  %613 = vst [vmem:[%s1520_s20 + $0xe0] sm:$0xff] %v549_v1  ;;  %614 = vst [vmem:[%s1520_s20 + $0xe8] sm:$0xff] %v550_v2  ;;  %v1824_v46 = vld [vmem:[#allocation19_spill] sm:$0xff]  ;;  %v1825_v30 = vld [vmem:[#allocation17_spill] sm:$0xff] }
 0x115   : > { %856 = vrsqrt.f32 %v415_v59  ;;  %615 = vst [vmem:[%s1520_s20 + $0xf0] sm:$0xff] %v551_v3  ;;  %v1826_v60 = vld [vmem:[#allocation18_spill] sm:$0xff]  ;;  %v1827_v1 = vld [vmem:[#allocation20_spill] sm:$0xff]  ;;  %v1828_v3 = vld [vmem:[#allocation23_spill] sm:$0xff] }
 0x116   : > { %858 = vrsqrt.f32 %v418_v27  ;;  %616 = vst [vmem:[%s1520_s20 + $0xf8] sm:$0xff] %v552_v54 }
 0x117   : > { %860 = vrsqrt.f32 %v417_v31 }
 0x118   : > { %v845_v0 = vpop.eup %844 }
 0x119   : > { %v459_v55 = vmul.f32 %v845_v0, %v1297_v62  ;;  %v460_v53 = vmul.f32 %v845_v0, %v1300_v63  ;;  %v461_v56 = vmul.f32 %v845_v0, %v1309_v12  ;;  %v462_v61 = vmul.f32 %v845_v0, %v1312_v13 }
 0x11a   : > { %v847_v50 = vpop.eup %846 }
 0x11b   : > { %v849_v7 = vpop.eup %848  ;;  %v471_v34 = vmul.f32 %v847_v50, %v1317_v22  ;;  %v472_v35 = vmul.f32 %v847_v50, %v1320_v23  ;;  %v473_v62 = vmul.f32 %v847_v50, %v1329_v32  ;;  %v474_v63 = vmul.f32 %v847_v50, %v1332_v33  ;;  %v1829_v50 = vld [vmem:[#allocation21_spill] sm:$0xff] }
 0x11c   : > { %v851_v12 = vpop.eup %850  ;;  %v545_v13 = vmul.f32 %v1486_v51, %v459_v55  ;;  %v546_v39 = vmul.f32 %v1488_v38, %v460_v53  ;;  %v547_v40 = vmul.f32 %v1490_v41, %v461_v56  ;;  %v548_v8 = vmul.f32 %v1492_v17, %v462_v61  ;;  %v1830_v53 = vld [vmem:[#allocation22_spill] sm:$0xff]  ;;  %v1831_v61 = vld [vmem:[#allocation24_spill] sm:$0xff] }
 0x11d   : > { %v853_v22 = vpop.eup %852  ;;  %v557_v23 = vmul.f32 %v1486_v51, %v471_v34  ;;  %v558_v32 = vmul.f32 %v1488_v38, %v472_v35  ;;  %v559_v33 = vmul.f32 %v1490_v41, %v473_v62  ;;  %v560_v10 = vmul.f32 %v1492_v17, %v474_v63  ;;  %v1832_v34 = vld [vmem:[#allocation26_spill] sm:$0xff] }
 0x11e   : > { %v855_v11 = vpop.eup %854  ;;  %609 = vst [vmem:[%s1520_s20 + $0xc0] sm:$0xff] %v545_v13  ;;  %610 = vst [vmem:[%s1520_s20 + $0xc8] sm:$0xff] %v546_v39  ;;  %v467_v42 = vmul.f32 %v849_v7, %v1335_v36  ;;  %v468_v48 = vmul.f32 %v849_v7, %v1818_v47  ;;  %v469_v57 = vmul.f32 %v849_v7, %v1819_v49 }
 0x11f   : > { %611 = vst [vmem:[%s1520_s20 + $0xd0] sm:$0xff] %v547_v40  ;;  %612 = vst [vmem:[%s1520_s20 + $0xd8] sm:$0xff] %v548_v8  ;;  %v470_v6 = vmul.f32 %v849_v7, %v1820_v4  ;;  %v857_v37 = vpop.eup %856  ;;  %v479_v44 = vmul.f32 %v851_v12, %v1821_v45  ;;  %v480_v18 = vmul.f32 %v851_v12, %v1822_v14 }
 0x120   : > { %621 = vst [vmem:[%s1520_s20 + $0x120] sm:$0xff] %v557_v23  ;;  %622 = vst [vmem:[%s1520_s20 + $0x128] sm:$0xff] %v558_v32  ;;  %v481_v36 = vmul.f32 %v851_v12, %v1823_v20  ;;  %v482_v9 = vmul.f32 %v851_v12, %v1824_v46  ;;  %v859_v52 = vpop.eup %858  ;;  %v553_v21 = vmul.f32 %v1486_v51, %v467_v42  ;;  %v1833_v23 = vld [vmem:[#allocation25_spill] sm:$0xff]  ;;  %v1838_v46 = vld [vmem:[#allocation31_spill] sm:$0xff] }
 0x121   : > { %623 = vst [vmem:[%s1520_s20 + $0x130] sm:$0xff] %v559_v33  ;;  %624 = vst [vmem:[%s1520_s20 + $0x138] sm:$0xff] %v560_v10  ;;  %v554_v25 = vmul.f32 %v1488_v38, %v468_v48  ;;  %v555_v5 = vmul.f32 %v1490_v41, %v469_v57  ;;  %v556_v26 = vmul.f32 %v1492_v17, %v470_v6  ;;  %v861_v28 = vpop.eup %860  ;;  %v1834_v33 = vld [vmem:[#allocation27_spill] sm:$0xff]  ;;  %v1836_v48 = vld [vmem:[#allocation29_spill] sm:$0xff] }
 0x122   : > { %v565_v59 = vmul.f32 %v1486_v51, %v479_v44  ;;  %v566_v27 = vmul.f32 %v1488_v38, %v480_v18  ;;  %v567_v31 = vmul.f32 %v1490_v41, %v481_v36  ;;  %v568_v19 = vmul.f32 %v1492_v17, %v482_v9  ;;  %617 = vst [vmem:[%s1520_s20 + $0x100] sm:$0xff] %v553_v21  ;;  %v1837_v57 = vld [vmem:[#allocation30_spill] sm:$0xff] }
 0x123   : > { %618 = vst [vmem:[%s1520_s20 + $0x108] sm:$0xff] %v554_v25  ;;  %619 = vst [vmem:[%s1520_s20 + $0x110] sm:$0xff] %v555_v5  ;;  %v475_v24 = vmul.f32 %v853_v22, %v1825_v30  ;;  %v476_v0 = vmul.f32 %v853_v22, %v1826_v60  ;;  %v477_v2 = vmul.f32 %v853_v22, %v1827_v1 }
 0x124   : > { %620 = vst [vmem:[%s1520_s20 + $0x118] sm:$0xff] %v556_v26  ;;  %v478_v54 = vmul.f32 %v853_v22, %v1828_v3  ;;  %629 = vst [vmem:[%s1520_s20 + $0x160] sm:$0xff] %v565_v59  ;;  %v487_v55 = vmul.f32 %v855_v11, %v1829_v50  ;;  %v488_v56 = vmul.f32 %v855_v11, %v1830_v53 }
 0x125   : > { %630 = vst [vmem:[%s1520_s20 + $0x168] sm:$0xff] %v566_v27  ;;  %631 = vst [vmem:[%s1520_s20 + $0x170] sm:$0xff] %v567_v31  ;;  %v489_v7 = vmul.f32 %v855_v11, %v1831_v61  ;;  %v490_v35 = vmul.f32 %v855_v11, %v1832_v34  ;;  %v561_v62 = vmul.f32 %v1486_v51, %v475_v24  ;;  %v1835_v11 = vld [vmem:[#allocation28_spill] sm:$0xff] }
 0x126   : > { %632 = vst [vmem:[%s1520_s20 + $0x178] sm:$0xff] %v568_v19  ;;  %v562_v63 = vmul.f32 %v1488_v38, %v476_v0  ;;  %v563_v12 = vmul.f32 %v1490_v41, %v477_v2  ;;  %v564_v13 = vmul.f32 %v1492_v17, %v478_v54  ;;  %v573_v39 = vmul.f32 %v1486_v51, %v487_v55 }
 0x127   : > { %v574_v40 = vmul.f32 %v1488_v38, %v488_v56  ;;  %v575_v8 = vmul.f32 %v1490_v41, %v489_v7  ;;  %v576_v22 = vmul.f32 %v1492_v17, %v490_v35  ;;  %625 = vst [vmem:[%s1520_s20 + $0x140] sm:$0xff] %v561_v62  ;;  %v483_v32 = vmul.f32 %v857_v37, %v1833_v23 }
 0x128   : > { %626 = vst [vmem:[%s1520_s20 + $0x148] sm:$0xff] %v562_v63  ;;  %627 = vst [vmem:[%s1520_s20 + $0x150] sm:$0xff] %v563_v12  ;;  %v484_v10 = vmul.f32 %v857_v37, %v1834_v33  ;;  %v485_v42 = vmul.f32 %v857_v37, %v1835_v11  ;;  %v486_v47 = vmul.f32 %v857_v37, %v1440_v15 }
 0x129   : > { %628 = vst [vmem:[%s1520_s20 + $0x158] sm:$0xff] %v564_v13  ;;  %637 = vst [vmem:[%s1520_s20 + $0x1a0] sm:$0xff] %v573_v39  ;;  %v495_v49 = vmul.f32 %v859_v52, %v1836_v48  ;;  %v496_v4 = vmul.f32 %v859_v52, %v1837_v57  ;;  %v497_v6 = vmul.f32 %v859_v52, %v1445_v43 }
 0x12a   : > { %638 = vst [vmem:[%s1520_s20 + $0x1a8] sm:$0xff] %v574_v40  ;;  %639 = vst [vmem:[%s1520_s20 + $0x1b0] sm:$0xff] %v575_v8  ;;  %v498_v45 = vmul.f32 %v859_v52, %v1471_v29  ;;  %v569_v44 = vmul.f32 %v1486_v51, %v483_v32  ;;  %v570_v15 = vmul.f32 %v1488_v38, %v484_v10  ;;  %v1839_v52 = vld [vmem:[#allocation32_spill] sm:$0xff] }
 0x12b   : > { %640 = vst [vmem:[%s1520_s20 + $0x1b8] sm:$0xff] %v576_v22  ;;  %v571_v37 = vmul.f32 %v1490_v41, %v485_v42  ;;  %v572_v14 = vmul.f32 %v1492_v17, %v486_v47  ;;  %v581_v18 = vmul.f32 %v1486_v51, %v495_v49  ;;  %v582_v43 = vmul.f32 %v1488_v38, %v496_v4 }
 0x12c   : > { %v583_v29 = vmul.f32 %v1490_v41, %v497_v6  ;;  %v584_v20 = vmul.f32 %v1492_v17, %v498_v45  ;;  %633 = vst [vmem:[%s1520_s20 + $0x180] sm:$0xff] %v569_v44  ;;  %634 = vst [vmem:[%s1520_s20 + $0x188] sm:$0xff] %v570_v15  ;;  %v491_v36 = vmul.f32 %v861_v28, %v1452_v16 }
 0x12d   : > { %635 = vst [vmem:[%s1520_s20 + $0x190] sm:$0xff] %v571_v37  ;;  %636 = vst [vmem:[%s1520_s20 + $0x198] sm:$0xff] %v572_v14  ;;  %v492_v9 = vmul.f32 %v861_v28, %v1838_v46  ;;  %v493_v21 = vmul.f32 %v861_v28, %v1839_v52  ;;  %v494_v25 = vmul.f32 %v861_v28, %v1478_v58 }
 0x12e   : > { %645 = vst [vmem:[%s1520_s20 + $0x1e0] sm:$0xff] %v581_v18  ;;  %646 = vst [vmem:[%s1520_s20 + $0x1e8] sm:$0xff] %v582_v43  ;;  %v577_v16 = vmul.f32 %v1486_v51, %v491_v36 }
 0x12f   : > { %647 = vst [vmem:[%s1520_s20 + $0x1f0] sm:$0xff] %v583_v29  ;;  %648 = vst [vmem:[%s1520_s20 + $0x1f8] sm:$0xff] %v584_v20  ;;  %v578_v5 = vmul.f32 %v1488_v38, %v492_v9  ;;  %v579_v58 = vmul.f32 %v1490_v41, %v493_v21  ;;  %v580_v26 = vmul.f32 %v1492_v17, %v494_v25 }
 0x130   : > { %641 = vst [vmem:[%s1520_s20 + $0x1c0] sm:$0xff] %v577_v16 }
 0x131   : > { %642 = vst [vmem:[%s1520_s20 + $0x1c8] sm:$0xff] %v578_v5  ;;  %643 = vst [vmem:[%s1520_s20 + $0x1d0] sm:$0xff] %v579_v58 }
 0x132   : > { %644 = vst [vmem:[%s1520_s20 + $0x1d8] sm:$0xff] %v580_v26 }
 0x133   : > { %933 = shalt.err (!%p930_p13)
}
 0x134   : > { %s934_s16 = scalar_lea.hbm %s1699_s5, 8192  ;;  %s938_s24 = scalar_lea.hbm %s1755_s2, 16384 }
 0x135   : > { %p935_p7 = scmp.ne.s32.totalorder %s1699_s5, %s934_s16  ;;  %p939_p1 = scmp.lt.u32.totalorder %s1699_s5, %s1755_s2 }
 0x136   : > { %p940_p11 = scmp.lt.u32.totalorder %s938_s24, %s934_s16  ;;  %p942_p9 = scmp.lt.u32.totalorder %s934_s16, %s1699_s5 }
 0x137   : > { %p936_p3 = pnand %p935_p7, %p1840_p10 }
 0x138   : > { %p941_p8 = por %p940_p11, %p939_p1 }
 0x139   : > { %p937_p12 = pneg %p936_p3 }
 0x13a   : > { %p943_p2 = por %p942_p9, %p941_p8 }
 0x13c   : > { %p944_p4 = pnand %p943_p2, %p937_p12 }
 0x13e   : > { %947 = shalt.err (!%p944_p4)
}
 0x13f   : > { %s997_s25 = smov 512   ;;  %s998_s29 = smov 32  }
 0x140   : > { %775 = dma.vmem_to_hbm [thread:$0]  (%p1840_p10), %s1701_s28, 8192, %s1699_s5, %s650_s26, %s997_s25, %s997_s25, %s998_s29  }
 0x141 PF: > { %s679_s20 = sand.u32 1, %s978_s9   ;;  %p1841_p5 = scmp.ne.s32.totalorder %s1786_s22, 0 }
 0x142   : > { %p1842_p0 = scmp.ge.s32.totalorder %s990_s12, 2  ;;  %s680_s23 = scalar_lea.sflag [#allocation4], %s679_s20 }
 0x144   : > { %p786_p6 = pnand %p1842_p0, %p1841_p5 }
 0x146   : > { %973 = dma.done.wait (!%p786_p6), %s680_s23, 8192  }
 0x147   : > { %975 = vsyncadd (!%p786_p6), %s680_s23, 4294959104  ;;  %p16_p13 = scmp.ge.s32.totalorder %s1039_s15, 4   ;;  %s1843_s9 = smov %s982_s10 }
 0x148   : > { %s1844_s10 = smov %s986_s11  ;;  %s1845_s11 = smov %s1051_s18 }
 0x149   : > { %s1846_s12 = smov %s1039_s15  ;;  %18 = sbr.rel (!%p16_p13) target bundleno = 6 (0x6), region = 77 }
 0x150   :  { %685 = vsyncpa [#allocation3], 1 }
 0x151   :  { %687 = vsyncpa [#allocation3 + $0x1], 1 }
 0x152   :  { %688 = vsyncpa [#allocation6], 1 }
 0x153   :  { %689 = vsyncpa [#allocation4], 1 }
 0x154   :  { %691 = vsyncpa [#allocation4 + $0x1], 1 }

</bundles_post_ra>
